<compile_context>
chip_gen: v6e
topology: v6e:2x2x1
jax: 0.10.0
libtpu: 0.0.40
codegen_flags: <defaults>
</compile_context>

<pallas_src>
import functools

import jax
import jax.numpy as jnp
from jax import lax
from jax.experimental import pallas as pl
from jax.experimental.pallas import tpu as pltpu


# ---------------------------------------------------------------------------
# Kernel 1: furthest point sampling (per batch).
# Emits a one-hot selection matrix sel[s, n] so downstream gathers are matmuls.
# ---------------------------------------------------------------------------
def _fps_kernel(xyz_ref, sel_ref):
    x = xyz_ref[0]                                   # (3, N) channel-major
    S = sel_ref.shape[1]
    N = x.shape[1]
    lane = lax.broadcasted_iota(jnp.int32, (1, N), 1)

    def body(i, carry):
        farthest, mindist = carry
        onehot = (lane == farthest).astype(jnp.float32)            # (1, N)
        sel_ref[0, pl.ds(i, 1), :] = onehot                        # record selection i
        centroid = jnp.sum(x * onehot, axis=1, keepdims=True)      # (3, 1)
        d = x - centroid
        dist = jnp.sum(d * d, axis=0, keepdims=True)               # (1, N)
        mindist = jnp.minimum(mindist, dist)
        maxval = jnp.max(mindist, axis=1, keepdims=True)           # (1, 1)
        # lowest index attaining the max (tie-break noted vs CUDA reference)
        nxt = jnp.min(jnp.where(mindist >= maxval, lane, N)).astype(jnp.int32)
        return nxt, mindist

    lax.fori_loop(
        0, S, body,
        (jnp.array(0, jnp.int32), jnp.full((1, N), 1e10, jnp.float32)))


def fps_select(xyz, npoint):
    B, C3, N = xyz.shape
    return pl.pallas_call(
        _fps_kernel,
        out_shape=jax.ShapeDtypeStruct((B, npoint, N), jnp.float32),
        grid=(B,),
        in_specs=[pl.BlockSpec((1, C3, N), lambda b: (b, 0, 0))],
        out_specs=pl.BlockSpec((1, npoint, N), lambda b: (b, 0, 0)),
        compiler_params=pltpu.CompilerParams(dimension_semantics=("parallel",)),
    )(xyz)


# ---------------------------------------------------------------------------
# Kernel 2: ball query + grouping (QueryAndGroup, use_xyz=True), per batch.
# Distances via matmul identity; neighbor selection via stacked one-hot matmuls.
# Output slab is channel-major [B, 3+D, nsample*S] (columns = k*S + s).
# ---------------------------------------------------------------------------
def _group_kernel(xyz_ref, pts_ref, sel_ref, newxyz_ref, slab_ref, *, radius, nsample):
    x = xyz_ref[0]                                   # (3, N)
    f = pts_ref[0]                                   # (D, N)
    sel = sel_ref[0]                                 # (S, N) one-hot rows
    S, N = sel.shape

    # centers gathered with a one-hot matmul: c[:, s] = xyz[:, fps_idx[s]]
    c = lax.dot_general(x, sel, (((1,), (1,)), ((), ())),
                        preferred_element_type=jnp.float32)            # (3, S)
    newxyz_ref[0] = c.astype(newxyz_ref.dtype)

    # squared distances center -> point, all on the MXU (no (S,N,3) temporary)
    xnorm = jnp.sum(x * x, axis=0, keepdims=True)                       # (1, N)
    cnorm = lax.dot_general(sel, xnorm, (((1,), (1,)), ((), ())),
                            preferred_element_type=jnp.float32)         # (S, 1)
    cross = lax.dot_general(c, x, (((0,), (0,)), ((), ())),
                            preferred_element_type=jnp.float32)         # (S, N)
    dist2 = xnorm + cnorm - 2.0 * cross                                  # (S, N)

    within = dist2 < (radius * radius)                                   # (S, N)
    within_f = within.astype(jnp.float32)

    # number of in-radius points with a strictly smaller index, via a triangular
    # matmul (guaranteed lowering; avoids a lane-axis cumsum).
    # TODO(synk): for large N replace the (N, N) triangular matmul with a tiled cumsum.
    row_i = lax.broadcasted_iota(jnp.int32, (N, N), 0)
    col_i = lax.broadcasted_iota(jnp.int32, (N, N), 1)
    tri = (row_i < col_i).astype(jnp.float32)                            # (N, N)
    cnt_less = lax.dot_general(within_f, tri, (((1,), (0,)), ((), ())),
                               preferred_element_type=jnp.float32).astype(jnp.int32)
    num_in = jnp.sum(within_f, axis=1, keepdims=True).astype(jnp.int32)  # (S, 1)

    lane_n = lax.broadcasted_iota(jnp.int32, (S, N), 1)
    oh_first = jnp.where(within & (cnt_less == 0), 1.0, 0.0)             # first in-radius point
    oh_first = jnp.where(num_in > 0, oh_first,
                         (lane_n == 0).astype(jnp.float32))              # ball_query zero-init fallback

    # Stack all nsample one-hot selection matrices (row r = k*S + s) so the whole
    # neighborhood gather is just two matmuls.
    ohs = []
    for k in range(nsample):
        oh_k = jnp.where(within & (cnt_less == k), 1.0, 0.0)             # (S, N)
        ohs.append(jnp.where(num_in > k, oh_k, oh_first))                # repeat first idx when short
    oh_all = jnp.concatenate(ohs, axis=0)                                # (nsample*S, N)

    gx = lax.dot_general(x, oh_all, (((1,), (1,)), ((), ())),
                         preferred_element_type=jnp.float32)             # (3, nsample*S)
    gf = lax.dot_general(f, oh_all, (((1,), (1,)), ((), ())),
                         preferred_element_type=jnp.float32)             # (D, nsample*S)
    c_rep = jnp.tile(c, (1, nsample))                                    # col k*S+s -> c[:, s]
    slab_ref[0] = jnp.concatenate([gx - c_rep, gf], axis=0).astype(slab_ref.dtype)


def query_and_group(xyz, points, sel, radius, nsample):
    B, _, N = xyz.shape
    D = points.shape[1]
    S = sel.shape[1]
    C0 = 3 + D
    kernel = functools.partial(_group_kernel, radius=float(radius), nsample=int(nsample))
    return pl.pallas_call(
        kernel,
        out_shape=(jax.ShapeDtypeStruct((B, 3, S), jnp.float32),
                   jax.ShapeDtypeStruct((B, C0, nsample * S), jnp.float32)),
        grid=(B,),
        in_specs=[pl.BlockSpec((1, 3, N), lambda b: (b, 0, 0)),
                  pl.BlockSpec((1, D, N), lambda b: (b, 0, 0)),
                  pl.BlockSpec((1, S, N), lambda b: (b, 0, 0))],
        out_specs=(pl.BlockSpec((1, 3, S), lambda b: (b, 0, 0)),
                   pl.BlockSpec((1, C0, nsample * S), lambda b: (b, 0, 0))),
        compiler_params=pltpu.CompilerParams(dimension_semantics=("parallel",)),
    )(xyz, points, sel)


# ---------------------------------------------------------------------------
# Kernel 3: one MLP layer = 1x1 Conv (bias=False) + BatchNorm2d (train-mode batch
# stats, biased var, eps=1e-5) + ReLU, with an optional fused max over the
# nsample neighbor axis (used for the last layer).  Two-phase grid: phase 0
# accumulates single-pass stats (sum / sumsq) per channel across all tiles,
# phase 1 recomputes the cheap matmul and normalizes.  bf16 MXU operands,
# f32 accumulate.
# ---------------------------------------------------------------------------
def _mlp_kernel(x_ref, w_ref, g_ref, beta_ref, o_ref, sum_ref, sq_ref,
                *, inv_m, pool, S):
    phase = pl.program_id(0)
    bi = pl.program_id(1)

    @pl.when(jnp.logical_and(phase == 0, bi == 0))
    def _():
        sum_ref[...] = jnp.zeros_like(sum_ref)
        sq_ref[...] = jnp.zeros_like(sq_ref)

    xb = x_ref[0].astype(jnp.bfloat16)               # (Cin, T)
    wb = w_ref[...].astype(jnp.bfloat16)             # (Cout, Cin)
    y = jnp.dot(wb, xb, preferred_element_type=jnp.float32)   # (Cout, T) f32

    @pl.when(phase == 0)
    def _():
        sum_ref[...] += jnp.sum(y, axis=1, keepdims=True)
        sq_ref[...] += jnp.sum(y * y, axis=1, keepdims=True)

    @pl.when(phase == 1)
    def _():
        mean = sum_ref[...] * inv_m
        var = sq_ref[...] * inv_m - mean * mean       # biased variance
        inv_std = lax.rsqrt(var + 1e-5)               # EUP
        scale = g_ref[...] * inv_std
        shift = beta_ref[...] - scale * mean
        z = jnp.maximum(scale * y + shift, 0.0)       # BN + ReLU (before any pooling)
        if pool is None:
            o_ref[0] = z.astype(o_ref.dtype)
        else:
            m = z[:, 0:S]
            for k in range(1, pool):
                m = jnp.maximum(m, z[:, k * S:(k + 1) * S])
            o_ref[0] = m.astype(o_ref.dtype)


def mlp_bn_relu(x, w, gamma, beta, pool_nsample=None):
    B, Cin, T = x.shape
    Cout = w.shape[0]
    if pool_nsample is None:
        pool, S, out_T = None, T, T
    else:
        pool = int(pool_nsample)
        S = T // pool
        out_T = S
    kernel = functools.partial(_mlp_kernel, inv_m=1.0 / float(B * T), pool=pool, S=S)
    return pl.pallas_call(
        kernel,
        out_shape=jax.ShapeDtypeStruct((B, Cout, out_T), jnp.float32),
        grid=(2, B),   # (phase, batch-tile); phase is outermost
        in_specs=[pl.BlockSpec((1, Cin, T), lambda p, b: (b, 0, 0)),
                  pl.BlockSpec((Cout, Cin), lambda p, b: (0, 0)),
                  pl.BlockSpec((Cout, 1), lambda p, b: (0, 0)),
                  pl.BlockSpec((Cout, 1), lambda p, b: (0, 0))],
        # output blocks are only produced in phase 1; during phase 0 keep block 0
        # resident (b * p == 0) so no unwritten buffer is ever flushed.
        out_specs=pl.BlockSpec((1, Cout, out_T), lambda p, b: (b * p, 0, 0)),
        scratch_shapes=[pltpu.VMEM((Cout, 1), jnp.float32),
                        pltpu.VMEM((Cout, 1), jnp.float32)],
        compiler_params=pltpu.CompilerParams(
            dimension_semantics=("arbitrary", "arbitrary")),
    )(x, w, gamma, beta)


# ---------------------------------------------------------------------------
# Module wrapper
# ---------------------------------------------------------------------------
def init_params(key, in_channel, mlp):
    """Per layer: (conv_w [Cout,Cin] (no bias), bn_gamma [Cout,1], bn_beta [Cout,1])."""
    params = []
    last = in_channel + 3                            # use_xyz=True
    for out_ch in mlp:
        key, kw, kg, kb = jax.random.split(key, 4)
        w = jax.random.normal(kw, (out_ch, last), jnp.float32) * 0.2
        g = 1.0 + 0.1 * jax.random.normal(kg, (out_ch, 1), jnp.float32)
        bt = 0.1 * jax.random.normal(kb, (out_ch, 1), jnp.float32)
        params.append((w, g, bt))
        last = out_ch
    return params


def pointnet_sa_forward(params, xyz, points, *, npoint, radius, nsample):
    """
    xyz: [B, 3, N], points: [B, D, N]
    returns new_xyz [B, 3, npoint], new_points [B, mlp[-1], npoint]
    """
    sel = fps_select(xyz, npoint)                                  # [B, S, N]
    new_xyz, slab = query_and_group(xyz, points, sel, radius, nsample)
    x = slab                                                       # [B, 3+D, nsample*S]
    n_layers = len(params)
    for i, (w, gamma, beta) in enumerate(params):
        is_last = (i == n_layers - 1)
        # fuse the max over nsample into the last layer's normalize phase
        x = mlp_bn_relu(x, w, gamma, beta,
                        pool_nsample=nsample if is_last else None)
    new_points = x                                                 # [B, mlp[-1], S]
    # TODO(synk): group_all / mean_aggr / use_act=False / InstanceNorm branches and
    # BatchNorm running-statistics updates (training side effect) are not modeled.
    return new_xyz, new_points


if __name__ == "__main__":
    key = jax.random.PRNGKey(0)
    B, N, D = 2, 32, 4
    npoint, radius, nsample = 16, 0.8, 8
    mlp = [32, 64]

    k1, k2, kp = jax.random.split(key, 3)
    xyz = jax.random.normal(k1, (B, 3, N), jnp.float32)
    points = jax.random.normal(k2, (B, D, N), jnp.float32)
    params = init_params(kp, D, mlp)

    new_xyz, new_points = pointnet_sa_forward(
        params, xyz, points, npoint=npoint, radius=radius, nsample=nsample)
    new_xyz, new_points = jax.block_until_ready((new_xyz, new_points))

    assert new_xyz.shape == (B, 3, npoint), new_xyz.shape
    assert new_points.shape == (B, mlp[-1], npoint), new_points.shape
    assert bool(jnp.all(jnp.isfinite(new_xyz)))
    assert bool(jnp.all(jnp.isfinite(new_points)))
    # sanity: sampled centers are actual input points, and FPS starts at index 0
    d2 = jnp.min(jnp.sum((new_xyz[:, :, :, None] - xyz[:, :, None, :]) ** 2, axis=1), axis=-1)
    assert float(jnp.max(d2)) < 1e-5
    assert bool(jnp.allclose(new_xyz[:, :, 0], xyz[:, :, 0], atol=1e-6))
    print("KERNEL_OK")
</pallas_src>

<mosaic_0001>
module attributes {stable_mosaic.version = 11 : i64} {
  func.func @_fps_kernel(%arg0: i32, %arg1: memref<1x3x32xf32, #tpu.memory_space<vmem>>, %arg2: memref<1x16x32xf32, #tpu.memory_space<vmem>>) attributes {dimension_semantics = [#tpu.dimension_semantics<parallel>], iteration_bounds = array<i64: 2>, scalar_prefetch = 0 : i64, scratch_operands = 0 : i64, tpu.core_type = #tpu.core_type<tc>, window_params = [{transform_indices = @transform_0, window_bounds = array<i64: 1, 3, 32>}, {transform_indices = @transform_1, window_bounds = array<i64: 1, 16, 32>}]} {
    %c0 = arith.constant 0 : index
    %c0_0 = arith.constant 0 : index
    %c0_1 = arith.constant 0 : index
    %0 = vector.load %arg1[%c0, %c0_0, %c0_1] : memref<1x3x32xf32, #tpu.memory_space<vmem>>, vector<1x3x32xf32>
    %1 = vector.shape_cast %0 : vector<1x3x32xf32> to vector<3x32xf32>
    %2 = tpu.iota {dimensions = array<i32: 1>} : vector<1x32xi32>
    %cst = arith.constant 1.000000e+10 : f32
    %3 = vector.broadcast %cst : f32 to vector<1x32xf32>
    %c0_i32 = arith.constant 0 : i32
    %c0_i32_2 = arith.constant 0 : i32
    %c16_i32 = arith.constant 16 : i32
    %4 = arith.addi %c0_i32_2, %c16_i32 : i32
    %c1_i32 = arith.constant 1 : i32
    %5:2 = scf.for %arg3 = %c0_i32_2 to %4 step %c1_i32 iter_args(%arg4 = %c0_i32, %arg5 = %3) -> (i32, vector<1x32xf32>)  : i32 {
      %6 = vector.broadcast %arg4 : i32 to vector<1x32xi32>
      %7 = arith.cmpi eq, %2, %6 : vector<1x32xi32>
      %8 = arith.extui %7 : vector<1x32xi1> to vector<1x32xi32>
      %9 = arith.sitofp %8 : vector<1x32xi32> to vector<1x32xf32>
      %c0_4 = arith.constant 0 : index
      %10 = arith.index_cast %arg3 : i32 to index
      %c0_5 = arith.constant 0 : index
      %11 = vector.load %arg2[%c0_4, %10, %c0_5] : memref<1x16x32xf32, #tpu.memory_space<vmem>>, vector<1x1x32xf32>
      %12 = vector.shape_cast %11 : vector<1x1x32xf32> to vector<1x32xf32>
      %13 = vector.shape_cast %9 : vector<1x32xf32> to vector<1x1x32xf32>
      tpu.vector_store %arg2[%c0_4, %10, %c0_5], %13 {strides = array<i32>} : memref<1x16x32xf32, #tpu.memory_space<vmem>>, vector<1x1x32xf32>,
      %14 = vector.broadcast %9 : vector<1x32xf32> to vector<3x32xf32>
      %15 = arith.mulf %1, %14 : vector<3x32xf32>
      %cst_6 = arith.constant dense<0.000000e+00> : vector<3xf32>
      %16 = vector.multi_reduction <add>, %15, %cst_6 [1] : vector<3x32xf32> to vector<3xf32>
      %17 = vector.shape_cast %16 : vector<3xf32> to vector<3x1xf32>
      %18 = vector.broadcast %17 : vector<3x1xf32> to vector<3x32xf32>
      %19 = arith.subf %1, %18 : vector<3x32xf32>
      %20 = arith.mulf %19, %19 : vector<3x32xf32>
      %cst_7 = arith.constant dense<0.000000e+00> : vector<32xf32>
      %21 = vector.multi_reduction <add>, %20, %cst_7 [0] : vector<3x32xf32> to vector<32xf32>
      %22 = vector.shape_cast %21 : vector<32xf32> to vector<1x32xf32>
      %23 = arith.minimumf %arg5, %22 : vector<1x32xf32>
      %cst_8 = arith.constant dense<0xFF800000> : vector<1xf32>
      %24 = vector.multi_reduction <maximumf>, %23, %cst_8 [1] : vector<1x32xf32> to vector<1xf32>
      %25 = vector.shape_cast %24 : vector<1xf32> to vector<1x1xf32>
      %26 = vector.broadcast %25 : vector<1x1xf32> to vector<1x32xf32>
      %27 = arith.cmpf oge, %23, %26 : vector<1x32xf32>
      %c32_i32 = arith.constant 32 : i32
      %28 = vector.broadcast %c32_i32 : i32 to vector<1x32xi32>
      %29 = arith.select %27, %2, %28 : vector<1x32xi1>, vector<1x32xi32>
      %30 = vector.shape_cast %29 : vector<1x32xi32> to vector<1x1x32xi32>
      %cst_9 = arith.constant dense<2147483647> : vector<1xi32>
      %31 = vector.multi_reduction <minsi>, %30, %cst_9 [1, 2] : vector<1x1x32xi32> to vector<1xi32>
      %32 = vector.shape_cast %31 : vector<1xi32> to vector<1x1x1xi32>
      %33 = vector.extract %32[0, 0, 0] : i32 from vector<1x1x1xi32>
      scf.yield %33, %23 : i32, vector<1x32xf32>
    }
    %c16_i32_3 = arith.constant 16 : i32
    return
  }
  func.func @transform_0(%arg0: i32) -> (i32, i32, i32) {
    %c0_i32 = arith.constant 0 : i32
    %c0_i32_0 = arith.constant 0 : i32
    %c0_i32_1 = arith.constant 0 : i32
    return %arg0, %c0_i32, %c0_i32_0 : i32, i32, i32
  }
  func.func @transform_1(%arg0: i32) -> (i32, i32, i32) {
    %c0_i32 = arith.constant 0 : i32
    %c0_i32_0 = arith.constant 0 : i32
    %c0_i32_1 = arith.constant 0 : i32
    return %arg0, %c0_i32, %c0_i32_0 : i32, i32, i32
  }
}

</mosaic_0001>

<bundles_post_ra>
// kernel: tpu_custom_call.1
= control target key start
LH: loop header
LB: loop body
LE: loop exit
PB: predicated region body
PF: predicated region fallthrough
CT: control target
= control target key end

     0   :  { %6 = vsyncpa [#allocation3], 0  ;;  %s567_s0 = inlined_call_operand.vmem [shape: f32[2,3,32], index: 0, kind: input, shape index: {}]   ;;  %s568_s1 = inlined_call_operand.hbm [shape: f32[2,16,32], index: 1, kind: output, shape index: {}]  }
   0x1   :  { %8 = vsyncpa [#allocation3 + $0x1], 0  ;;  %s436_s6 = smov 0   ;;  %s438_s7 = smov 0  }
   0x2   :  { %s440_s8 = smov 0   ;;  %s442_s9 = smov 0  }
   0x3 LB: > { %s457_s10 = sadd.s32 4294967295, %s408_s9   ;;  %s255_s11 = sadd.s32 4294967294, %s408_s9   ;;  %s408_s9 = sphi %s442_s9, %s574_s9   ;;  %s404_s8 = sphi %s440_s8, %s573_s8   ;;  %s400_s7 = sphi %s438_s7, %s572_s7   ;;  %s396_s6 = sphi %s436_s6, %s571_s6  }
   0x4   : > { %s461_s12 = sadd.s32 1, %s408_s9   ;;  %s47_s13 = sadd.s32 1, %s404_s8 }
   0x5   : > { %s44_s14 = ssub.s32 %s408_s9, %s461_s12  ;;  %p57_p0 = scmp.ne.s32.totalorder %s404_s8, %s400_s7 }
   0x6   : > { %p45_p1 = scmp.eq.s32.totalorder %s44_s14, 0  ;;  %p58_p2 = scmp.eq.s32.totalorder %s457_s10, 1 }
   0x7   : > { %p63_p3 = scmp.ne.s32.totalorder %s400_s7, %s396_s6  ;;  %p64_p4 = scmp.eq.s32.totalorder %s255_s11, 1 }
   0x8   : > { %s472_s15 = scalar_select %p45_p1, %s404_s8, %s47_s13  }
   0x9   : > { %p474_p5 = por %p58_p2, %p57_p0  ;;  %p478_p6 = por %p64_p4, %p63_p3 }
   0xa   : > { %p258_p7 = scmp.ge.s32.totalorder %s408_s9, 1  ;;  %p89_p8 = scmp.lt.s32.totalorder %s408_s9, 3 }
   0xc   : > { %p90_p9 = pnand %p258_p7, %p89_p8 }
   0xd   : > { %s105_s18 = sand.u32 (!%p90_p9), 1, %s400_s7   ;;  %p108_p10 = scmp.lt.s32.totalorder (!%p90_p9), %s457_s10, 1 }
   0xe   : > { %93 = sbr.rel (%p90_p9) target bundleno = 678 (0x2a6), region = 24  ;;  %s488_s19 = sshll.u32 (!%p90_p9), %s105_s18, 4 }
   0xf   : > { %s107_s25 = scalar_lea.vmem (!%p90_p9), [#allocation2], %s488_s19  ;;  %s497_s26 = smov (!%p90_p9), 0  }
  0x10   : > { %s499_s27 = smov (!%p90_p9), 0  }
  0x13   : > { %v113_v0 = vlaneseq  ;;  %s109_s20 = scalar_select %p108_p10, %s457_s10, 1  ;;  %v410_v3 = vmov 1e+10  }
  0x15   : > { %v490_v1 = vand.u32 127, %v113_v0  ;;  %s260_s21 = sshll.u32 %s109_s20, 2 }
  0x16   : > { %s111_s24 = scalar_lea.vmem %s567_s0, %s260_s21 }
  0x17   : > { %v112_v2 = vld [vmem:[%s111_s24] sm:$0x7] }
  0x18 LB: >> { %v123_v4 = vstv %s416_s26  ;;  %s127_s28 = scalar_lea.vmem %s107_s25, %s420_s27 [#allocation2]  ;;  %vm128_vm0 = vcmask 253952   ;;  %v422_v5 = vmov 0.0   ;;  %vm131_vm2 = vcmask 256000   ;;  %s120_s27 = sadd.s32 1, %s420_s27   ;;  %s420_s27 = sphi %s499_s27, %s120_s27   ;;  %s416_s26 = sphi %s497_s26, %s269_s26   ;;  %v412_v3 = vphi %v410_v3, %v144_v3  }
  0x19   : >> { %vm124_vm1 = vcmp.eq.s32.totalorder %v490_v1, %v123_v4  ;;  %vm145_vm3 = vcmask 261120   ;;  %p117_p11 = scmp.ge.s32.totalorder %s120_s27, 16  }
  0x1a   : >> { %v261_v6 = vsel %vm124_vm1, 1.0, %v422_v5  ;;  %s267_s29 = sshll.u32 (%p117_p11), %s457_s10, 8  ;;  %s181_s4 = sshll.u32 (%p117_p11), %s107_s25, 4  ;;  %s523_s4 = int_to_ptr.vmem [resolvable:$true] %s181_s4 }
  0x1b   : >> { %v130_v7 = vmul.f32 %v261_v6, %v112_v2  ;;  %129 = vst.msk [vmem:[%s127_s28] sm:$0x1] %vm128_vm0, %v261_v6  ;;  %s519_s3 = scalar_lea.hbm (%p117_p11), %s568_s1, %s267_s29  ;;  %s527_s5 = scalar_lea.sflag (%p117_p11), [#allocation3], %s105_s18 }
  0x1c   : > { %s336_s11 = scalar_lea.vmem (%p117_p11), %s523_s4, 256  ;;  %s423_s10 = smov (%p117_p11), [#allocation2]  }
  0x1d   : >> { %v132_v8 = vsel %vm131_vm2, %v130_v7, 0.0  ;;  %p337_p12 = scmp.ne.s32.totalorder (%p117_p11), %s523_s4, %s336_s11  ;;  %s340_s13 = sshll.u32 (%p117_p11), %s423_s10, 4  ;;  %s341_s13 = int_to_ptr.vmem [resolvable:$false] %s340_s13 }
  0x1e   : >> { %133 = vadd.xlane.f32.xlu0 %v132_v8  ;;  %s342_s14 = scalar_lea.vmem (%p117_p11), %s341_s13, 512  ;;  %p343_p1 = scmp.lt.s32.totalorder (%p117_p11), %s523_s4, %s341_s13 }
  0x1f   : > { %p338_p13 = pnand (%p117_p11), %p337_p12, %p474_p5  ;;  %p344_p2 = scmp.lt.s32.totalorder (%p117_p11), %s342_s14, %s336_s11 }
  0x21   : > { %p339_p0 = pneg (%p117_p11), %p338_p13  ;;  %p345_p3 = por (%p117_p11), %p344_p2, %p343_p1 }
  0x23   : > { %p346_p4 = pnand (%p117_p11), %p345_p3, %p339_p0 }
  0xa7   : >> { %v134_v9 = vpop.xlane.xlu0 %133 }
  0xa8   : >> { %v135_v10 = vsub.f32 %v112_v2, %v134_v9 }
  0xaa   : >> { %v136_v11 = vmul.f32 %v135_v10, %v135_v10 }
  0xac   : >> { %v137_v12 = vsel %vm131_vm2, %v136_v11, 0.0 }
  0xad   : >> { %v138_v13 = vrot.slane %v137_v12, 4 }
  0xaf   : >> { %v139_v14 = vadd.f32 %v138_v13, %v137_v12 }
  0xb1   : >> { %v140_v15 = vrot.slane %v139_v14, 2 }
  0xb3   : >> { %v141_v16 = vadd.f32 %v140_v15, %v139_v14 }
  0xb5   : >> { %v142_v17 = vrot.slane %v141_v16, 1 }
  0xb7   : >> { %v143_v18 = vadd.f32 %v142_v17, %v141_v16 }
  0xb9   : >> { %v144_v3 = vmin.f32 %v412_v3, %v143_v18  }
  0xbb   : >> { %v146_v19 = vsel %vm145_vm3, %v144_v3, -inf }
  0xbc   : >> { %147 = vmax.xlane.f32.xlu0 %v146_v19 }
 0x145   : >> { %v148_v20 = vpop.xlane.xlu0 %147 }
 0x146   : >> { %vm149_vm4 = vcmp.ge.f32.partialorder %v144_v3, %v148_v20 }
 0x147   : >> { %v150_v21 = vsel %vm149_vm4, %v490_v1, 32 }
 0x148   : >> { %v151_v22 = vsel %vm145_vm3, %v150_v21, 2147483647 }
 0x149   : >> { %v153_v23 = vshra.s32 %v151_v22, 16  ;;  %v152_v25 = vand.u32 65535, %v151_v22 }
 0x14b   : >> { %v155_v24 = vcvt.s32.f32 %v153_v23  ;;  %v154_v27 = vcvt.s32.f32 %v152_v25 }
 0x14d   : >> { %156 = vmin.xlane.f32.xlu1 %v155_v24 }
 0x1d6   : >> { %v157_v26 = vpop.xlane.xlu1 %156 }
 0x1d7   : >> { %vm158_vm5 = vcmp.eq.f32.partialorder %v155_v24, %v157_v26  ;;  %v163_v29 = vcvt.f32.s32 %v157_v26 }
 0x1d8   : >> { %v159_v28 = vsel %vm158_vm5, %v154_v27, inf }
 0x1d9   : >> { %160 = vmin.xlane.f32.xlu1 %v159_v28  ;;  %v164_v32 = vshll.u32 %v163_v29, 16 }
 0x262   : >> { %v161_v30 = vpop.xlane.xlu1 %160 }
 0x263   : >> { %v162_v31 = vcvt.f32.s32 %v161_v30 }
 0x265   : >> { %v165_v33 = vadd.s32 %v164_v32, %v162_v31 }
 0x267   : >> { %268 = vpush %v165_v33 }
 0x294   : > { %119 = sbr.rel (!%p117_p11) target bundleno = 24 (0x18), region = 67 }
 0x298   : >> { %s269_s26 = spop %268  }
 0x299   : > { %349 = shalt.err (!%p346_p4)
}
 0x29a   : > { %s350_s18 = scalar_lea.hbm %s519_s3, 256  ;;  %s354_s21 = scalar_lea.hbm %s568_s1, 512 }
 0x29b   : > { %p351_p7 = scmp.ne.s32.totalorder %s519_s3, %s350_s18  ;;  %p355_p10 = scmp.lt.s32.totalorder %s519_s3, %s568_s1 }
 0x29c   : > { %p356_p11 = scmp.lt.s32.totalorder %s354_s21, %s350_s18 }
 0x29d   : > { %p352_p8 = pnand %p351_p7, %p474_p5 }
 0x29e   : > { %p357_p12 = por %p356_p11, %p355_p10 }
 0x29f   : > { %p353_p9 = pneg %p352_p8 }
 0x2a1   : > { %p358_p13 = pnand %p357_p12, %p353_p9 }
 0x2a3   : > { %361 = shalt.err (!%p358_p13)
}
 0x2a4   : > { %s424_s24 = smov 128   ;;  %s425_s25 = smov 8  }
 0x2a5   : > { %270 = dma.vmem_to_hbm [thread:$0]  (%p474_p5), %s523_s4, 256, %s519_s3, %s527_s5, %s424_s24, %s424_s24, %s425_s25  }
 0x2a6 PF: > { %p276_p0 = scmp.ge.s32.totalorder %s408_s9, 2  ;;  %s196_s26 = sand.u32 1, %s396_s6  }
 0x2a7   : > { %s197_s27 = scalar_lea.sflag [#allocation3], %s196_s26 }
 0x2a8   : > { %p273_p1 = pnand %p276_p0, %p478_p6 }
 0x2aa   : > { %p274_p2 = pneg %p273_p1 }
 0x2ac   : > { %391 = dma.done.wait (%p274_p2), %s197_s27, 256  }
 0x2ad   : > { %393 = vsyncadd (%p274_p2), %s197_s27, 4294967040  ;;  %p11_p3 = scmp.ge.s32.totalorder %s461_s12, 4   ;;  %s571_s6 = smov %s400_s7 }
 0x2ae   : > { %s572_s7 = smov %s404_s8  ;;  %s573_s8 = smov %s472_s15 }
 0x2af   : > { %s574_s9 = smov %s461_s12  ;;  %13 = sbr.rel (!%p11_p3) target bundleno = 3 (0x3), region = 78 }
 0x2b4   :  { %202 = vsyncpa [#allocation3], 1 }
 0x2b5   :  { %204 = vsyncpa [#allocation3 + $0x1], 1 }

</bundles_post_ra>
